<compile_context>
chip_gen: v7x
topology: tpu7x:2x2x1
jax: 0.10.0
libtpu: 0.0.40
codegen_flags: <defaults>
</compile_context>

<pallas_src>
import jax
import jax.numpy as jnp
from jax.experimental import pallas as pl
from jax.experimental.pallas import tpu as pltpu


def _round_up(x, m):
    return ((x + m - 1) // m) * m


def fusion_head_kernel(txt_ref, img_ref,
                       w1_ref, b1_ref,
                       w2_ref, b2_ref,
                       wfc_ref, bfc_ref,
                       out_ref):
    # In-kernel f32 -> bf16 cast of the activations (VPU work, hidden under the DMA);
    # avoids a separate fusion-breaking XLA cast pass over HBM.
    txt = txt_ref[...].astype(jnp.bfloat16)
    img = img_ref[...].astype(jnp.bfloat16)

    # txt branch: linear1 (768 -> 128) + relu.  bf16 x bf16 on the MXU, f32 accumulation.
    t = jnp.dot(txt, w1_ref[...], preferred_element_type=jnp.float32) + b1_ref[...]
    t = jnp.maximum(t, 0.0)

    # img branch: linear2 (1000 -> 128) + relu.  Full-K block; Mosaic masks the partial
    # lane tile of the contracting dim.
    i = jnp.dot(img, w2_ref[...], preferred_element_type=jnp.float32) + b2_ref[...]
    i = jnp.maximum(i, 0.0)

    # fc on concat([t, i], -1): split the (256, 3) weight at the static, tile-aligned
    # 128-row boundary (no data movement).  Kept in f32 (tiny).
    out = (jnp.dot(t, wfc_ref[:128, :], preferred_element_type=jnp.float32)
           + jnp.dot(i, wfc_ref[128:, :], preferred_element_type=jnp.float32)
           + bfc_ref[...])
    out_ref[...] = out.astype(out_ref.dtype)


def prepare_params(w1, b1, w2, b2, wfc, bfc):
    """One-time parameter prep: bf16-cast the two big weights; fc weight / biases stay f32."""
    return (w1.astype(jnp.bfloat16), b1.astype(jnp.float32),
            w2.astype(jnp.bfloat16), b2.astype(jnp.float32),
            wfc.astype(jnp.float32), bfc.astype(jnp.float32))


def fusion_head(txt_cls, img_feat, w1, b1, w2, b2, wfc, bfc, *, bm=512):
    B, k_txt = txt_cls.shape
    _, k_img = img_feat.shape
    n_hid = w1.shape[1]          # 128
    n_out = wfc.shape[1]         # 3

    # Batch tile: large enough to sit near the HBM roofline (>=512), but capped at
    # ~ceil(B/2) (rounded to the 8-sublane grain) so B > 8 always yields >= 2 grid
    # steps and both v7x TensorCores are used.  Partial last block is masked by Pallas.
    bm = min(bm, max(8, _round_up(pl.cdiv(B, 2), 8)))
    grid = (pl.cdiv(B, bm),)

    row = lambda shape: pl.BlockSpec(shape, lambda i: (i, 0))   # batch-tiled
    rep = lambda shape: pl.BlockSpec(shape, lambda i: (0, 0))   # VMEM-resident across grid

    flops = 2 * B * (k_txt * n_hid + k_img * n_hid + 2 * n_hid * n_out)
    bytes_accessed = (B * (k_txt + k_img) * 4                 # f32 activations in
                      + (k_txt + k_img) * n_hid * 2           # bf16 weights
                      + 2 * n_hid * 4                         # biases
                      + (2 * n_hid) * n_out * 4 + n_out * 4   # fc weight + bias
                      + B * n_out * 4)                        # f32 output

    return pl.pallas_call(
        fusion_head_kernel,
        out_shape=jax.ShapeDtypeStruct((B, n_out), jnp.float32),
        grid=grid,
        in_specs=[
            row((bm, k_txt)), row((bm, k_img)),
            rep(w1.shape), rep(b1.shape),
            rep(w2.shape), rep(b2.shape),
            rep(wfc.shape), rep(bfc.shape),
        ],
        out_specs=row((bm, n_out)),
        compiler_params=pltpu.CompilerParams(
            dimension_semantics=("parallel",),   # shard batch tiles across TCs (v7x)
        ),
        cost_estimate=pl.CostEstimate(
            flops=flops, transcendentals=0, bytes_accessed=bytes_accessed),
    )(txt_cls, img_feat, w1, b1, w2, b2, wfc, bfc)


def reference_matched(txt_cls, img_feat, w1, b1, w2, b2, wfc, bfc):
    """Same math as the kernel (bf16 big matmuls, f32 accumulation / epilogue / fc)."""
    t = jnp.dot(txt_cls.astype(jnp.bfloat16), w1.astype(jnp.bfloat16),
                preferred_element_type=jnp.float32) + b1
    t = jnp.maximum(t, 0.0)
    i = jnp.dot(img_feat.astype(jnp.bfloat16), w2.astype(jnp.bfloat16),
                preferred_element_type=jnp.float32) + b2
    i = jnp.maximum(i, 0.0)
    cat = jnp.concatenate([t, i], axis=-1)
    return jnp.dot(cat, wfc, preferred_element_type=jnp.float32) + bfc


def reference_f32(txt_cls, img_feat, w1, b1, w2, b2, wfc, bfc):
    """Full-f32 module semantics (loose sanity check of the bf16 path)."""
    t = jnp.maximum(txt_cls @ w1 + b1, 0.0)
    i = jnp.maximum(img_feat @ w2 + b2, 0.0)
    cat = jnp.concatenate([t, i], axis=-1)
    return cat @ wfc + bfc


if __name__ == "__main__":
    key = jax.random.PRNGKey(0)
    ks = jax.random.split(key, 8)

    # Parameters of nn.Linear(768,128), nn.Linear(1000,128), nn.Linear(256,3),
    # stored pre-transposed as [in, out].
    w1 = jax.random.normal(ks[2], (768, 128), dtype=jnp.float32) * 0.02
    b1 = jax.random.normal(ks[3], (1, 128), dtype=jnp.float32) * 0.02
    w2 = jax.random.normal(ks[4], (1000, 128), dtype=jnp.float32) * 0.02
    b2 = jax.random.normal(ks[5], (1, 128), dtype=jnp.float32) * 0.02
    wfc = jax.random.normal(ks[6], (256, 3), dtype=jnp.float32) * 0.02
    bfc = jax.random.normal(ks[7], (1, 3), dtype=jnp.float32) * 0.02
    params = prepare_params(w1, b1, w2, b2, wfc, bfc)

    for B in (2, 20):   # B=20 exercises the 2-step grid with a masked partial last block
        # Backbone feature stand-ins: BERT CLS [B, 768], ResNet18 logits [B, 1000].
        txt_cls = jax.random.normal(ks[0], (B, 768), dtype=jnp.float32)
        img_feat = jax.random.normal(ks[1], (B, 1000), dtype=jnp.float32)

        out = fusion_head(txt_cls, img_feat, *params)
        out = jax.block_until_ready(out)
        assert out.shape == (B, 3), out.shape

        # Strict check against a reference doing the same bf16-matmul / f32-accumulate math.
        ref = reference_matched(txt_cls, img_feat, w1, b1, w2, b2, wfc, bfc)
        assert jnp.allclose(out, ref, atol=1e-3, rtol=1e-3), (B, out, ref)

        # Loose sanity check against full-f32 module semantics (bf16 quantization noise).
        ref32 = reference_f32(txt_cls, img_feat, w1, b1, w2, b2, wfc, bfc)
        assert jnp.allclose(out, ref32, atol=5e-2, rtol=5e-2), (B, out, ref32)

    print("KERNEL_OK")
</pallas_src>

<mosaic_0001>
module attributes {stable_mosaic.version = 11 : i64} {
  func.func @fusion_head_kernel(%arg0: i32, %arg1: memref<8x768xf32, #tpu.memory_space<vmem>>, %arg2: memref<8x1000xf32, #tpu.memory_space<vmem>>, %arg3: memref<768x128xbf16, #tpu.memory_space<vmem>>, %arg4: memref<1x128xf32, #tpu.memory_space<vmem>>, %arg5: memref<1000x128xbf16, #tpu.memory_space<vmem>>, %arg6: memref<1x128xf32, #tpu.memory_space<vmem>>, %arg7: memref<256x3xf32, #tpu.memory_space<vmem>>, %arg8: memref<1x3xf32, #tpu.memory_space<vmem>>, %arg9: memref<8x3xf32, #tpu.memory_space<vmem>>) attributes {dimension_semantics = [#tpu.dimension_semantics<parallel>], iteration_bounds = array<i64: 1>, scalar_prefetch = 0 : i64, scratch_operands = 0 : i64, tpu.core_type = #tpu.core_type<tc>, window_params = [{transform_indices = @transform_0, window_bounds = array<i64: 8, 768>}, {transform_indices = @transform_1, window_bounds = array<i64: 8, 1000>}, {pipeline_mode = #tpu.pipeline_mode<synchronous>, transform_indices = @transform_2, window_bounds = array<i64: 768, 128>}, {pipeline_mode = #tpu.pipeline_mode<synchronous>, transform_indices = @transform_3, window_bounds = array<i64: 1, 128>}, {pipeline_mode = #tpu.pipeline_mode<synchronous>, transform_indices = @transform_4, window_bounds = array<i64: 1000, 128>}, {pipeline_mode = #tpu.pipeline_mode<synchronous>, transform_indices = @transform_5, window_bounds = array<i64: 1, 128>}, {pipeline_mode = #tpu.pipeline_mode<synchronous>, transform_indices = @transform_6, window_bounds = array<i64: 256, 3>}, {pipeline_mode = #tpu.pipeline_mode<synchronous>, transform_indices = @transform_7, window_bounds = array<i64: 1, 3>}, {transform_indices = @transform_8, window_bounds = array<i64: 8, 3>}]} {
    %c0 = arith.constant 0 : index
    %c0_0 = arith.constant 0 : index
    %0 = vector.load %arg1[%c0, %c0_0] : memref<8x768xf32, #tpu.memory_space<vmem>>, vector<8x768xf32>
    %1 = arith.truncf %0 : vector<8x768xf32> to vector<8x768xbf16>
    %c0_1 = arith.constant 0 : index
    %c0_2 = arith.constant 0 : index
    %2 = vector.load %arg2[%c0_1, %c0_2] : memref<8x1000xf32, #tpu.memory_space<vmem>>, vector<8x1000xf32>
    %3 = arith.truncf %2 : vector<8x1000xf32> to vector<8x1000xbf16>
    %c0_3 = arith.constant 0 : index
    %c0_4 = arith.constant 0 : index
    %4 = vector.load %arg3[%c0_3, %c0_4] : memref<768x128xbf16, #tpu.memory_space<vmem>>, vector<768x128xbf16>
    %cst = arith.constant dense<0.000000e+00> : vector<8x128xf32>
    %5 = tpu.matmul %1, %4, %cst {dimension_numbers = #tpu.dot_dimension_numbers<[1], [0], [0], [1], [0, 0, 1, 1], [], []>} : vector<8x768xbf16>, vector<768x128xbf16>, vector<8x128xf32> -> vector<8x128xf32>
    %c0_5 = arith.constant 0 : index
    %c0_6 = arith.constant 0 : index
    %6 = vector.load %arg4[%c0_5, %c0_6] : memref<1x128xf32, #tpu.memory_space<vmem>>, vector<1x128xf32>
    %7 = vector.broadcast %6 : vector<1x128xf32> to vector<8x128xf32>
    %8 = arith.addf %5, %7 : vector<8x128xf32>
    %cst_7 = arith.constant 0.000000e+00 : f32
    %9 = vector.broadcast %cst_7 : f32 to vector<8x128xf32>
    %10 = arith.maximumf %8, %9 : vector<8x128xf32>
    %c0_8 = arith.constant 0 : index
    %c0_9 = arith.constant 0 : index
    %11 = vector.load %arg5[%c0_8, %c0_9] : memref<1000x128xbf16, #tpu.memory_space<vmem>>, vector<1000x128xbf16>
    %cst_10 = arith.constant dense<0.000000e+00> : vector<8x128xf32>
    %12 = tpu.matmul %3, %11, %cst_10 {dimension_numbers = #tpu.dot_dimension_numbers<[1], [0], [0], [1], [0, 0, 1, 1], [], []>} : vector<8x1000xbf16>, vector<1000x128xbf16>, vector<8x128xf32> -> vector<8x128xf32>
    %c0_11 = arith.constant 0 : index
    %c0_12 = arith.constant 0 : index
    %13 = vector.load %arg6[%c0_11, %c0_12] : memref<1x128xf32, #tpu.memory_space<vmem>>, vector<1x128xf32>
    %14 = vector.broadcast %13 : vector<1x128xf32> to vector<8x128xf32>
    %15 = arith.addf %12, %14 : vector<8x128xf32>
    %cst_13 = arith.constant 0.000000e+00 : f32
    %16 = vector.broadcast %cst_13 : f32 to vector<8x128xf32>
    %17 = arith.maximumf %15, %16 : vector<8x128xf32>
    %c0_14 = arith.constant 0 : index
    %c0_15 = arith.constant 0 : index
    %18 = vector.load %arg7[%c0_14, %c0_15] : memref<256x3xf32, #tpu.memory_space<vmem>>, vector<128x3xf32>
    %cst_16 = arith.constant dense<0.000000e+00> : vector<8x3xf32>
    %19 = tpu.matmul %10, %18, %cst_16 {dimension_numbers = #tpu.dot_dimension_numbers<[1], [0], [0], [1], [0, 0, 1, 1], [], []>} : vector<8x128xf32>, vector<128x3xf32>, vector<8x3xf32> -> vector<8x3xf32>
    %c128 = arith.constant 128 : index
    %c0_17 = arith.constant 0 : index
    %20 = vector.load %arg7[%c128, %c0_17] : memref<256x3xf32, #tpu.memory_space<vmem>>, vector<128x3xf32>
    %cst_18 = arith.constant dense<0.000000e+00> : vector<8x3xf32>
    %21 = tpu.matmul %17, %20, %cst_18 {dimension_numbers = #tpu.dot_dimension_numbers<[1], [0], [0], [1], [0, 0, 1, 1], [], []>} : vector<8x128xf32>, vector<128x3xf32>, vector<8x3xf32> -> vector<8x3xf32>
    %22 = arith.addf %19, %21 : vector<8x3xf32>
    %c0_19 = arith.constant 0 : index
    %c0_20 = arith.constant 0 : index
    %23 = vector.load %arg8[%c0_19, %c0_20] : memref<1x3xf32, #tpu.memory_space<vmem>>, vector<1x3xf32>
    %24 = vector.broadcast %23 : vector<1x3xf32> to vector<8x3xf32>
    %25 = arith.addf %22, %24 : vector<8x3xf32>
    %c0_21 = arith.constant 0 : index
    %c0_22 = arith.constant 0 : index
    %26 = vector.load %arg9[%c0_21, %c0_22] : memref<8x3xf32, #tpu.memory_space<vmem>>, vector<8x3xf32>
    tpu.vector_store %arg9[%c0_21, %c0_22], %25 {strides = array<i32>} : memref<8x3xf32, #tpu.memory_space<vmem>>, vector<8x3xf32>,
    return
  }
  func.func @transform_0(%arg0: i32) -> (i32, i32) {
    %c0_i32 = arith.constant 0 : i32
    %c0_i32_0 = arith.constant 0 : i32
    return %arg0, %c0_i32 : i32, i32
  }
  func.func @transform_1(%arg0: i32) -> (i32, i32) {
    %c0_i32 = arith.constant 0 : i32
    %c0_i32_0 = arith.constant 0 : i32
    return %arg0, %c0_i32 : i32, i32
  }
  func.func @transform_2(%arg0: i32) -> (i32, i32) {
    %c0_i32 = arith.constant 0 : i32
    %c0_i32_0 = arith.constant 0 : i32
    %c0_i32_1 = arith.constant 0 : i32
    return %c0_i32, %c0_i32_0 : i32, i32
  }
  func.func @transform_3(%arg0: i32) -> (i32, i32) {
    %c0_i32 = arith.constant 0 : i32
    %c0_i32_0 = arith.constant 0 : i32
    %c0_i32_1 = arith.constant 0 : i32
    return %c0_i32, %c0_i32_0 : i32, i32
  }
  func.func @transform_4(%arg0: i32) -> (i32, i32) {
    %c0_i32 = arith.constant 0 : i32
    %c0_i32_0 = arith.constant 0 : i32
    %c0_i32_1 = arith.constant 0 : i32
    return %c0_i32, %c0_i32_0 : i32, i32
  }
  func.func @transform_5(%arg0: i32) -> (i32, i32) {
    %c0_i32 = arith.constant 0 : i32
    %c0_i32_0 = arith.constant 0 : i32
    %c0_i32_1 = arith.constant 0 : i32
    return %c0_i32, %c0_i32_0 : i32, i32
  }
  func.func @transform_6(%arg0: i32) -> (i32, i32) {
    %c0_i32 = arith.constant 0 : i32
    %c0_i32_0 = arith.constant 0 : i32
    %c0_i32_1 = arith.constant 0 : i32
    return %c0_i32, %c0_i32_0 : i32, i32
  }
  func.func @transform_7(%arg0: i32) -> (i32, i32) {
    %c0_i32 = arith.constant 0 : i32
    %c0_i32_0 = arith.constant 0 : i32
    %c0_i32_1 = arith.constant 0 : i32
    return %c0_i32, %c0_i32_0 : i32, i32
  }
  func.func @transform_8(%arg0: i32) -> (i32, i32) {
    %c0_i32 = arith.constant 0 : i32
    %c0_i32_0 = arith.constant 0 : i32
    return %arg0, %c0_i32 : i32, i32
  }
}

</mosaic_0001>

<bundles_post_ra>
// kernel: tpu_custom_call.1
= control target key start
LH: loop header
LB: loop body
LE: loop exit
PB: predicated region body
PF: predicated region fallthrough
CT: control target
= control target key end

     0   :  { %13 = vsyncpa [#allocation3], 0  ;;  %s2539_s0 = inlined_call_operand.vmem [shape: f32[2,768], index: 0, kind: input, shape index: {}]   ;;  %s2540_s1 = inlined_call_operand.vmem [shape: f32[2,1000], index: 1, kind: input, shape index: {}]   ;;  %s2541_s2 = inlined_call_operand.hbm [shape: bf16[768,128], index: 2, kind: input, shape index: {}]   ;;  %s2542_s3 = inlined_call_operand.vmem [shape: f32[1,128], index: 3, kind: input, shape index: {}]   ;;  %s2543_s4 = inlined_call_operand.hbm [shape: bf16[1000,128], index: 4, kind: input, shape index: {}]   ;;  %s2544_s5 = inlined_call_operand.vmem [shape: f32[1,128], index: 5, kind: input, shape index: {}]   ;;  %s2545_s6 = inlined_call_operand.vmem [shape: f32[256,3], index: 6, kind: input, shape index: {}]   ;;  %s2546_s7 = inlined_call_operand.vmem [shape: f32[1,3], index: 7, kind: input, shape index: {}]   ;;  %s2547_s8 = inlined_call_operand.hbm [shape: f32[2,3], index: 8, kind: output, shape index: {}]  }
   0x1   :  { %14 = vsyncpa [#allocation6], 0 }
   0x2   :  { %15 = vsyncpa [#allocation4], 0  ;;  %s2247_s27 = smov [#allocation2]   ;;  %s2175_s9 = scalar_lea.hbm %s2541_s2, 6144 }
   0x3   :  { %s25_s28 = sshll.u32 %s2247_s27, 4  ;;  %p2176_p0 = scmp.ne.s32.totalorder %s2541_s2, %s2175_s9  ;;  %s26_s28 = int_to_ptr.vmem [resolvable:$true] %s25_s28 }
   0x4   :  { %p2179_p1 = scmp.lt.u32.totalorder %s2175_s9, %s2541_s2 }
   0x6   :  { %p2181_p2 = pnand %p2179_p1, %p2176_p0 }
   0x8   :  { %2184 = shalt.err (!%p2181_p2)
}
   0x9   :  { %s2185_s14 = scalar_lea.vmem %s26_s28, 6144  ;;  %p2190_p4 = scmp.lt.s32.totalorder %s26_s28, %s26_s28 }
   0xa   :  { %p2186_p3 = scmp.ne.s32.totalorder %s26_s28, %s2185_s14  ;;  %p2191_p5 = scmp.lt.s32.totalorder %s2185_s14, %s2185_s14 }
   0xc   :  { %p2192_p6 = por %p2191_p5, %p2190_p4 }
   0xe   :  { %p2193_p7 = pnand %p2192_p6, %p2186_p3 }
  0x10   :  { %2196 = shalt.err (!%p2193_p7)
}
  0x11   :  { %s2248_s15 = smov 64   ;;  %s2249_s16 = smov 4  }
  0x12   :  { %31 = dma.hbm_to_vmem [thread:$0]  %s2541_s2, 6144, %s26_s28, [#allocation3], %s2248_s15, %s2248_s15, %s2249_s16  }
  0x13   :  { %s2250_s19 = smov [#allocation5]   ;;  %s2197_s23 = scalar_lea.hbm %s2543_s4, 8000 }
  0x14   :  { %s39_s20 = sshll.u32 %s2250_s19, 4  ;;  %p2198_p8 = scmp.ne.s32.totalorder %s2543_s4, %s2197_s23  ;;  %s40_s20 = int_to_ptr.vmem [resolvable:$true] %s39_s20 }
  0x15   :  { %p2201_p9 = scmp.lt.u32.totalorder %s2197_s23, %s2543_s4 }
  0x17   :  { %p2203_p10 = pnand %p2201_p9, %p2198_p8 }
  0x19   :  { %2206 = shalt.err (!%p2203_p10)
}
  0x1a   :  { %s2207_s29 = scalar_lea.vmem %s40_s20, 8000  ;;  %p2212_p12 = scmp.lt.s32.totalorder %s40_s20, %s40_s20 }
  0x1b   :  { %p2208_p11 = scmp.ne.s32.totalorder %s40_s20, %s2207_s29  ;;  %p2213_p13 = scmp.lt.s32.totalorder %s2207_s29, %s2207_s29 }
  0x1d   :  { %p2214_p0 = por %p2213_p13, %p2212_p12 }
  0x1f   :  { %p2215_p1 = pnand %p2214_p0, %p2208_p11 }
  0x21   :  { %2218 = shalt.err (!%p2215_p1)
}
  0x22   :  { %45 = dma.hbm_to_vmem [thread:$0]  %s2543_s4, 8000, %s40_s20, [#allocation6], %s2248_s15, %s2248_s15, %s2249_s16  }
  0x23   :  { %2241 = dma.done.wait [#allocation3], 6144  }
  0x24   :  { %2242 = vsyncadd [#allocation3], 4294961152 }
  0x25   :  { %2243 = dma.done.wait [#allocation6], 8000  }
  0x26   :  { %2244 = vsyncadd [#allocation6], 4294959296  ;;  %v2044_v0 = vld [vmem:[#allocation2 + $0x40] sm:$0xff]   ;;  %v2048_v4 = vld [vmem:[#allocation2 + $0x48] sm:$0xff]   ;;  %v2251_v23 = vmov 1983009808   ;;  %v82_v25 = vlaneseq }
  0x27   :  { %v2045_v1 = vld [vmem:[#allocation2] sm:$0xff]   ;;  %1748 = vmatprep.subr.bf16.mxu0 %v2044_v0  ;;  %v2049_v5 = vld [vmem:[#allocation2 + $0x8] sm:$0xff]   ;;  %v2052_v8 = vld [vmem:[#allocation2 + $0x50] sm:$0xff]   ;;  %v80_v24 = vunpack.c.l.s4 %v2251_v23  ;;  %vm1264_vm0 = vcmask 850944   ;;  %vm1268_vm1 = vcmask 1043456   ;;  %vm2254_vm2 = vmmov 0  }
  0x28   :  { %v2046_v2 = vld [vmem:[#allocation2 + $0xc0] sm:$0xff]   ;;  %1749 = vmatpush3.bf16.msra.mxu0 %v2045_v1  ;;  %v2050_v6 = vld [vmem:[#allocation2 + $0xc8] sm:$0xff]   ;;  %v2053_v9 = vld [vmem:[#allocation2 + $0x10] sm:$0xff]   ;;  %v83_v31 = vshrl.u32 %v82_v25, 7  ;;  %vm1613_vm3 = vcmask 23552  }
  0x29   :  { %v2047_v3 = vld [vmem:[#allocation2 + $0x80] sm:$0xff]   ;;  %1770 = vmatprep.subr.bf16.mxu1 %v2046_v2  ;;  %1750 = vmatprep.subr.bf16.mxu0 %v2048_v4  ;;  %v2051_v7 = vld [vmem:[#allocation2 + $0x88] sm:$0xff]   ;;  %v2054_v10 = vld [vmem:[#allocation2 + $0xd0] sm:$0xff]   ;;  %v81_v30 = vunpack.c.0.s8 %v80_v24 }
  0x2a   :  { %1771 = vmatpush3.bf16.msra.mxu1 %v2047_v3  ;;  %v2055_v11 = vld [vmem:[#allocation2 + $0x90] sm:$0xff]   ;;  %v2056_v12 = vld [vmem:[#allocation2 + $0x58] sm:$0xff]   ;;  %v2060_v16 = vld [vmem:[#allocation2 + $0x60] sm:$0xff]  }
  0x2b   :  { %1772 = vmatprep.subr.bf16.mxu1 %v2050_v6  ;;  %v2057_v13 = vld [vmem:[#allocation2 + $0x18] sm:$0xff]   ;;  %v2061_v17 = vld [vmem:[#allocation2 + $0x20] sm:$0xff]   ;;  %v2064_v20 = vld [vmem:[#allocation2 + $0x68] sm:$0xff]   ;;  %v2328_v36 = vsub.s32 %v81_v30, %v83_v31 }
  0x2c   :  { %1751 = vmatpush3.bf16.msra.mxu0 %v2049_v5  ;;  %v2058_v14 = vld [vmem:[#allocation2 + $0xd8] sm:$0xff]   ;;  %v2062_v18 = vld [vmem:[#allocation2 + $0xe0] sm:$0xff]   ;;  %v2065_v21 = vld [vmem:[#allocation2 + $0x28] sm:$0xff]  }
  0x2d   :  { %1752 = vmatprep.subr.bf16.mxu0 %v2052_v8  ;;  %v2059_v15 = vld [vmem:[#allocation2 + $0x98] sm:$0xff]   ;;  %v2063_v19 = vld [vmem:[#allocation2 + $0xa0] sm:$0xff]   ;;  %v2066_v22 = vld [vmem:[#allocation2 + $0xe8] sm:$0xff]  }
  0x2e   :  { %1773 = vmatpush3.bf16.msra.mxu1 %v2051_v7  ;;  %v2067_v26 = vld [vmem:[#allocation2 + $0xa8] sm:$0xff]   ;;  %v2068_v27 = vld [vmem:[#allocation2 + $0x70] sm:$0xff]   ;;  %v2072_v33 = vld [vmem:[#allocation2 + $0x78] sm:$0xff]  }
  0x2f   :  { %1774 = vmatprep.subr.bf16.mxu1 %v2054_v10  ;;  %v2069_v28 = vld [vmem:[#allocation2 + $0x30] sm:$0xff]   ;;  %v2073_v34 = vld [vmem:[#allocation2 + $0x38] sm:$0xff]   ;;  %v2075_v37 = vld [vmem:[%s2539_s0] ss:$12 sps:$4 sm:$0xff]  }
  0x30   :  { %1753 = vmatpush3.bf16.msra.mxu0 %v2053_v9  ;;  %v2070_v29 = vld [vmem:[#allocation2 + $0xf0] sm:$0xff]   ;;  %v2074_v35 = vld [vmem:[#allocation2 + $0xf8] sm:$0xff]   ;;  %v85_v40 = vrot.slane %v2075_v37, %v2328_v36  ;;  %v2080_v42 = vld [vmem:[#allocation2 + $0x140] sm:$0xff]  }
  0x31   :  { %1754 = vmatprep.subr.bf16.mxu0 %v2056_v12  ;;  %v2071_v32 = vld [vmem:[#allocation2 + $0xb0] sm:$0xff]   ;;  %v2077_v38 = vld [vmem:[%s2539_s0 + $0x18] ss:$12 sps:$4 sm:$0xff]   ;;  %v2082_v44 = vld [vmem:[%s2539_s0 + $0x1c] ss:$12 sps:$4 sm:$0xff]  }
  0x32   :  { %1775 = vmatpush3.bf16.msra.mxu1 %v2055_v11  ;;  %v2079_v39 = vld [vmem:[#allocation2 + $0xb8] sm:$0xff]   ;;  %v99_v41 = vrot.slane %v2077_v38, %v2328_v36  ;;  %v2081_v43 = vld [vmem:[%s2539_s0 + $0x4] ss:$12 sps:$4 sm:$0xff]   ;;  %v106_v48 = vrot.slane %v2082_v44, %v2328_v36  ;;  %v2086_v55 = vld [vmem:[#allocation2 + $0x148] sm:$0xff]  }
  0x33   :  { %1776 = vmatprep.subr.bf16.mxu1 %v2058_v14  ;;  %v92_v47 = vrot.slane %v2081_v43, %v2328_v36  ;;  %v2084_v49 = vld [vmem:[#allocation5 + $0x40] sm:$0xff]   ;;  %v2087_v59 = vld [vmem:[#allocation2 + $0x108] sm:$0xff]   ;;  %v2090_v61 = vld [vmem:[#allocation2 + $0x150] sm:$0xff]  }
  0x34   :  { %1755 = vmatpush3.bf16.msra.mxu0 %v2057_v13  ;;  %v108_v45 = vcombine.high %v85_v40, %v99_v41  ;;  %v107_v46 = vcombine.low %v85_v40, %v99_v41  ;;  %v2083_v52 = vld [vmem:[#allocation2 + $0x100] sm:$0xff]   ;;  %v2088_v60 = vld [vmem:[#allocation5 + $0x48] sm:$0xff]   ;;  %v2091_v63 = vld [vmem:[#allocation2 + $0x110] sm:$0xff]  }
  0x35   :  { %1756 = vmatprep.subr.bf16.mxu0 %v2060_v16  ;;  %v110_v53 = vcombine.high %v92_v47, %v106_v48  ;;  %v109_v54 = vcombine.low %v92_v47, %v106_v48  ;;  %v2085_v56 = vld [vmem:[#allocation5] sm:$0xff]   ;;  %v2089_v62 = vld [vmem:[#allocation5 + $0x8] sm:$0xff]   ;;  %v2092_v0 = vld [vmem:[#allocation5 + $0x50] sm:$0xff]  }
  0x36   :  { %1777 = vmatpush3.bf16.msra.mxu1 %v2059_v15  ;;  %v136_v50 = vpack.c.bf16 %v108_v45, %v108_v45  ;;  %v135_v51 = vpack.c.bf16 %v107_v46, %v107_v46  ;;  %v2094_v1 = vld [vmem:[#allocation2 + $0x158] sm:$0xff]   ;;  %v2093_v2 = vld [vmem:[#allocation5 + $0x10] sm:$0xff]   ;;  %v2098_v5 = vld [vmem:[#allocation2 + $0x160] sm:$0xff]  }
  0x37   :  { %1778 = vmatprep.subr.bf16.mxu1 %v2062_v18  ;;  %v138_v57 = vpack.c.bf16 %v110_v53, %v110_v53  ;;  %v137_v58 = vpack.c.bf16 %v109_v54, %v109_v54  ;;  %v2095_v3 = vld [vmem:[#allocation2 + $0x118] sm:$0xff]   ;;  %v2099_v7 = vld [vmem:[#allocation2 + $0x120] sm:$0xff]   ;;  %v2102_v9 = vld [vmem:[#allocation2 + $0x168] sm:$0xff]  }
  0x38   :  { %1757 = vmatpush3.bf16.msra.mxu0 %v2061_v17  ;;  %668 = vmatprep.mubr.bf16.mxu0 %v136_v50  ;;  %v2096_v4 = vld [vmem:[#allocation5 + $0x58] sm:$0xff]   ;;  %v2100_v8 = vld [vmem:[#allocation5 + $0x60] sm:$0xff]   ;;  %v2103_v11 = vld [vmem:[#allocation2 + $0x128] sm:$0xff]  }
  0x39   :  { %1758 = vmatprep.subr.bf16.mxu0 %v2064_v20  ;;  %708 = vmatprep.mubr.bf16.mxu1 %v138_v57  ;;  %v2097_v6 = vld [vmem:[#allocation5 + $0x18] sm:$0xff]   ;;  %v2101_v10 = vld [vmem:[#allocation5 + $0x20] sm:$0xff]   ;;  %v2104_v12 = vld [vmem:[#allocation5 + $0x68] sm:$0xff]  }
  0x3a   :  { %1779 = vmatpush3.bf16.msra.mxu1 %v2063_v19  ;;  %v2106_v13 = vld [vmem:[#allocation2 + $0x170] sm:$0xff]   ;;  %v2105_v14 = vld [vmem:[#allocation5 + $0x28] sm:$0xff]   ;;  %v2110_v18 = vld [vmem:[#allocation2 + $0x178] sm:$0xff]  }
  0x3b   :  { %1780 = vmatprep.subr.bf16.mxu1 %v2066_v22  ;;  %v2107_v15 = vld [vmem:[#allocation2 + $0x130] sm:$0xff]   ;;  %v2111_v19 = vld [vmem:[#allocation2 + $0x138] sm:$0xff]   ;;  %v2114_v22 = vld [vmem:[%s2539_s0 + $0x20] ss:$12 sps:$4 sm:$0xff]  }
  0x3c   :  { %1759 = vmatpush3.bf16.msra.mxu0 %v2065_v21  ;;  %v2108_v16 = vld [vmem:[#allocation5 + $0x70] sm:$0xff]   ;;  %v2112_v20 = vld [vmem:[#allocation5 + $0x78] sm:$0xff]   ;;  %v126_v25 = vrot.slane %v2114_v22, %v2328_v36  ;;  %v2124_v38 = vld [vmem:[#allocation5 + $0xc8] sm:$0xff]  }
  0x3d   :  { %1760 = vmatprep.subr.bf16.mxu0 %v2068_v27  ;;  %v2109_v17 = vld [vmem:[#allocation5 + $0x30] sm:$0xff]   ;;  %v2115_v23 = vld [vmem:[#allocation5 + $0x38] sm:$0xff]   ;;  %v2123_v41 = vld [vmem:[#allocation5 + $0x100] sm:$0xff]  }
  0x3e   :  { %1781 = vmatpush3.bf16.msra.mxu1 %v2067_v26  ;;  %v2113_v21 = vld [vmem:[%s2539_s0 + $0x8] ss:$12 sps:$4 sm:$0xff]   ;;  %v2116_v26 = vld [vmem:[#allocation5 + $0xc0] sm:$0xff]   ;;  %v2132_v50 = vld [vmem:[#allocation5 + $0xd8] sm:$0xff]  }
  0x3f   :  { %1782 = vmatprep.subr.bf16.mxu1 %v2070_v29  ;;  %v119_v24 = vrot.slane %v2113_v21, %v2328_v36  ;;  %v2117_v29 = vld [vmem:[#allocation5 + $0x80] sm:$0xff]   ;;  %v2126_v45 = vld [vmem:[#allocation5 + $0x148] sm:$0xff]   ;;  %v2128_v46 = vld [vmem:[#allocation5 + $0xd0] sm:$0xff]  }
  0x40   :  { %1761 = vmatpush3.bf16.msra.mxu0 %v2069_v28  ;;  %v2118_v30 = vld [vmem:[%s2540_s1] ss:$16 sps:$4 sm:$0xff]   ;;  %v2127_v47 = vld [vmem:[#allocation5 + $0x108] sm:$0xff]   ;;  %v2134_v53 = vld [vmem:[#allocation5 + $0x158] sm:$0xff]  }
  0x41   :  { %1762 = vmatprep.subr.bf16.mxu0 %v2072_v33  ;;  %v128_v27 = vcombine.high %v119_v24, %v126_v25  ;;  %v127_v28 = vcombine.low %v119_v24, %v126_v25  ;;  %v2120_v31 = vld [vmem:[%s2540_s1 + $0x20] ss:$16 sps:$4 sm:$0xff]  }
  0x42   :  { %1783 = vmatpush3.bf16.msra.mxu1 %v2071_v32  ;;  %v181_v37 = vrot.slane %v2120_v31, %v2328_v36  ;;  %v2129_v48 = vld [vmem:[#allocation5 + $0x90] sm:$0xff]   ;;  %v2136_v54 = vld [vmem:[#allocation5 + $0xe0] sm:$0xff]   ;;  %v2161_v31 = vld [vmem:[#allocation5 + $0x188] sm:$0xff]  }
  0x43   :  { %1784 = vmatprep.subr.bf16.mxu1 %v2074_v35  ;;  %v140_v32 = vpack.c.bf16 %v128_v27, %v128_v27  ;;  %v139_v33 = vpack.c.bf16 %v127_v28, %v127_v28  ;;  %v167_v35 = vrot.slane %v2118_v30, %v2328_v36  ;;  %v2138_v57 = vld [vmem:[#allocation5 + $0x160] sm:$0xff]  }
  0x44   :  { %1763 = vmatpush3.bf16.msra.mxu0 %v2073_v34  ;;  %v2122_v34 = vld [vmem:[#allocation5 + $0x140] sm:$0xff]  }
  0x45   :  { %1792 = vmatprep.subr.bf16.mxu0 %v2080_v42  ;;  %v189_v40 = vcombine.low %v167_v35, %v181_v37  ;;  %v2125_v42 = vld [vmem:[#allocation5 + $0x88] sm:$0xff]   ;;  %v2160_v24 = vld [vmem:[#allocation5 + $0x180] sm:$0xff]  }
  0x46   :  { %1785 = vmatpush3.bf16.msra.mxu1 %v2079_v39  ;;  %v190_v39 = vcombine.high %v167_v35, %v181_v37  ;;  %v2166_v35 = vld [vmem:[#allocation5 + $0x1b0] sm:$0xff]   ;;  %v2167_v37 = vld [vmem:[#allocation5 + $0x1b8] sm:$0xff]  }
  0x47   :  { %1814 = vmatprep.subr.bf16.mxu1 %v2084_v49  ;;  %669 = vmatmul.mubr.bf16.vlgmr.msra.gmra.mrb[0].mxu0 %v135_v51  ;;  %v237_v44 = vpack.c.bf16 %v189_v40, %v189_v40  ;;  %v2130_v49 = vld [vmem:[#allocation5 + $0x150] sm:$0xff]  }
  0x48   :  { %1793 = vmatpush3.bf16.msra.mxu0 %v2083_v52  ;;  %748 = vmatprep.mubr.bf16.mxu0 %v140_v32  ;;  %v238_v43 = vpack.c.bf16 %v190_v39, %v190_v39  ;;  %v2131_v51 = vld [vmem:[#allocation5 + $0x110] sm:$0xff]   ;;  %v2133_v52 = vld [vmem:[#allocation5 + $0x98] sm:$0xff]   ;;  %v2169_v39 = vld [vmem:[#allocation5 + $0x1c8] sm:$0xff]  }
  0x49   :  { %1794 = vmatprep.subr.bf16.mxu0 %v2086_v55  ;;  %709 = vmatmul.mubr.bf16.vlgmr.msra.gmra.mrb[0].mxu1 %v137_v58  ;;  %v2135_v55 = vld [vmem:[#allocation5 + $0x118] sm:$0xff]   ;;  %v2140_v58 = vld [vmem:[#allocation5 + $0xe8] sm:$0xff]   ;;  %v2170_v40 = vld [vmem:[#allocation5 + $0x1d0] sm:$0xff]  }
  0x4a   :  { %1815 = vmatpush3.bf16.msra.mxu1 %v2085_v56  ;;  %1304 = vmatprep.mubr.bf16.mxu1 %v238_v43  ;;  %v2137_v56 = vld [vmem:[#allocation5 + $0xa0] sm:$0xff]   ;;  %v2163_v32 = vld [vmem:[#allocation5 + $0x198] sm:$0xff]   ;;  %v2173_v43 = vld [vmem:[#allocation5 + $0x1e8] sm:$0xff]  }
  0x4b   :  { %1816 = vmatprep.subr.bf16.mxu1 %v2088_v60  ;;  %v2141_v60 = vld [vmem:[#allocation5 + $0xa8] sm:$0xff]  }
  0x4c   :  { %1795 = vmatpush3.bf16.msra.mxu0 %v2087_v59  ;;  %v2139_v59 = vld [vmem:[#allocation5 + $0x120] sm:$0xff]  }
  0x4d   :  { %1796 = vmatprep.subr.bf16.mxu0 %v2090_v61  ;;  %v2142_v61 = vld [vmem:[#allocation5 + $0x168] sm:$0xff]  }
  0x4e   :  { %1817 = vmatpush3.bf16.msra.mxu1 %v2089_v62  ;;  %v2144_v62 = vld [vmem:[#allocation5 + $0xf0] sm:$0xff]  }
  0x4f   :  { %1818 = vmatprep.subr.bf16.mxu1 %v2092_v0  ;;  %v2145_v0 = vld [vmem:[#allocation5 + $0xb0] sm:$0xff]  }
  0x50   :  { %1797 = vmatpush3.bf16.msra.mxu0 %v2091_v63  ;;  %v2143_v63 = vld [vmem:[#allocation5 + $0x128] sm:$0xff]  }
  0x51   :  { %1798 = vmatprep.subr.bf16.mxu0 %v2094_v1  ;;  %v2146_v1 = vld [vmem:[#allocation5 + $0x170] sm:$0xff]  }
  0x52   :  { %1819 = vmatpush3.bf16.msra.mxu1 %v2093_v2  ;;  %v2148_v2 = vld [vmem:[#allocation5 + $0xf8] sm:$0xff]  }
  0x53   :  { %1820 = vmatprep.subr.bf16.mxu1 %v2096_v4  ;;  %v2149_v4 = vld [vmem:[#allocation5 + $0xb8] sm:$0xff]  }
  0x54   :  { %1799 = vmatpush3.bf16.msra.mxu0 %v2095_v3  ;;  %v2147_v3 = vld [vmem:[#allocation5 + $0x130] sm:$0xff]  }
  0x55   :  { %1800 = vmatprep.subr.bf16.mxu0 %v2098_v5  ;;  %v2151_v5 = vld [vmem:[%s2540_s1 + $0x4] ss:$16 sps:$4 sm:$0xff]  }
  0x56   :  { %1821 = vmatpush3.bf16.msra.mxu1 %v2097_v6  ;;  %v2152_v6 = vld [vmem:[%s2540_s1 + $0x24] ss:$16 sps:$4 sm:$0xff]  }
  0x57   :  { %1822 = vmatprep.subr.bf16.mxu1 %v2100_v8  ;;  %v174_v8 = vrot.slane %v2151_v5, %v2328_v36 }
  0x58   :  { %1801 = vmatpush3.bf16.msra.mxu0 %v2099_v7  ;;  %v2150_v7 = vld [vmem:[#allocation5 + $0x178] sm:$0xff]  }
  0x59   :  { %1802 = vmatprep.subr.bf16.mxu0 %v2102_v9  ;;  %v188_v9 = vrot.slane %v2152_v6, %v2328_v36 }
  0x5a   :  { %1823 = vmatpush3.bf16.msra.mxu1 %v2101_v10  ;;  %v2154_v10 = vld [vmem:[%s2540_s1 + $0x8] ss:$16 sps:$4 sm:$0xff]  }
  0x5b   :  { %1824 = vmatprep.subr.bf16.mxu1 %v2104_v12  ;;  %v2157_v12 = vld [vmem:[%s2540_s1 + $0x28] ss:$16 sps:$4 sm:$0xff]  }
  0x5c   :  { %1803 = vmatpush3.bf16.msra.mxu0 %v2103_v11  ;;  %v2156_v11 = vld [vmem:[%s2540_s1 + $0xc] ss:$16 sps:$4 sm:$0xff]  }
  0x5d   :  { %1804 = vmatprep.subr.bf16.mxu0 %v2106_v13  ;;  %v2159_v13 = vld [vmem:[%s2540_s1 + $0x2c] ss:$16 sps:$4 sm:$0xff]  }
  0x5e   :  { %1825 = vmatpush3.bf16.msra.mxu1 %v2105_v14  ;;  %v192_v14 = vcombine.high %v174_v8, %v188_v9  ;;  %v224_v21 = vrot.slane %v2159_v13, %v2328_v36 }
  0x5f   :  { %1826 = vmatprep.subr.bf16.mxu1 %v2108_v16  ;;  %v191_v16 = vcombine.low %v174_v8, %v188_v9  ;;  %v1463_v9 = vld [vmem:[%s2545_s6 + $0xf0] sm:$0xff] }
  0x60   :  { %1805 = vmatpush3.bf16.msra.mxu0 %v2107_v15  ;;  %v2153_v15 = vld [vmem:[#allocation5 + $0x138] sm:$0xff]   ;;  %v240_v22 = vpack.c.bf16 %v192_v14, %v192_v14 }
  0x61   :  { %1806 = vmatprep.subr.bf16.mxu0 %v2110_v18  ;;  %v203_v18 = vrot.slane %v2154_v10, %v2328_v36  ;;  %v1464_v10 = vld [vmem:[%s2545_s6 + $0xf8] sm:$0xff] }
  0x62   :  { %1827 = vmatpush3.bf16.msra.mxu1 %v2109_v17  ;;  %v2252_v17 = vmov 0   ;;  %v2006_v13 = vpack.c.bf16 %v1464_v10, %v1463_v9  ;;  %v1445_v9 = vld [vmem:[%s2545_s6 + $0x60] sm:$0xff]  ;;  %v1446_v10 = vld [vmem:[%s2545_s6 + $0x68] sm:$0xff] }
  0x63   :  { %1828 = vmatprep.subr.bf16.mxu1 %v2112_v20  ;;  %v210_v20 = vrot.slane %v2156_v11, %v2328_v36 }
  0x64   :  { %1807 = vmatpush3.bf16.msra.mxu0 %v2111_v19  ;;  %v217_v19 = vrot.slane %v2157_v12, %v2328_v36  ;;  %v2162_v36 = vld [vmem:[#allocation5 + $0x190] sm:$0xff]  }
  0x65   :  { %1836 = vmatprep.subr.bf16.mxu0 %v2116_v26  ;;  %v228_v27 = vcombine.high %v210_v20, %v224_v21 }
  0x66   :  { %1829 = vmatpush3.bf16.msra.mxu1 %v2115_v23  ;;  %v239_v23 = vpack.c.bf16 %v191_v16, %v191_v16  ;;  %v226_v25 = vcombine.high %v203_v18, %v217_v19  ;;  %v225_v26 = vcombine.low %v203_v18, %v217_v19 }
  0x67   :  { %1858 = vmatprep.subr.bf16.mxu1 %v2122_v34  ;;  %749 = vmatmul.mubr.bf16.vlgmr.msra.gmra.mrb[4].mxu0 %v139_v33  ;;  %v244_v30 = vpack.c.bf16 %v228_v27, %v228_v27  ;;  %v2164_v33 = vld [vmem:[#allocation5 + $0x1a0] sm:$0xff]   ;;  %v2165_v34 = vld [vmem:[#allocation5 + $0x1a8] sm:$0xff]  }
  0x68   :  { %1837 = vmatpush3.bf16.msra.mxu0 %v2117_v29  ;;  %1344 = vmatprep.mubr.bf16.mxu0 %v240_v22  ;;  %v242_v28 = vpack.c.bf16 %v226_v25, %v226_v25  ;;  %v241_v29 = vpack.c.bf16 %v225_v26, %v225_v26 }
  0x69   :  { %1838 = vmatprep.subr.bf16.mxu0 %v2124_v38  ;;  %1305 = vmatmul.mubr.bf16.vlgmr.msra.gmra.mrb[4].mxu1 %v237_v44  ;;  %v2168_v38 = vld [vmem:[#allocation5 + $0x1c0] sm:$0xff]   ;;  %v2174_v44 = vld [vmem:[#allocation5 + $0x1f0] ss:$0 sps:$4 sm:$0xff]  }
  0x6a   :  { %1859 = vmatpush3.bf16.msra.mxu1 %v2123_v41  ;;  %1384 = vmatprep.mubr.bf16.mxu1 %v242_v28  ;;  %v2171_v41 = vld [vmem:[#allocation5 + $0x1d8] sm:$0xff]  }
  0x6b   :  { %1860 = vmatprep.subr.bf16.mxu1 %v2126_v45  ;;  %v227_v45 = vcombine.low %v210_v20, %v224_v21  ;;  %v2255_v21 = vmov 0.0  }
  0x6c   :  { %1839 = vmatpush3.bf16.msra.mxu0 %v2125_v42  ;;  %v2172_v42 = vld [vmem:[#allocation5 + $0x1e0] sm:$0xff]  }
  0x6d   :  { %1840 = vmatprep.subr.bf16.mxu0 %v2128_v46  ;;  %v1270_v46 = vsel %vm1268_vm1, %v2174_v44, 0 }
  0x6e   :  { %1861 = vmatpush3.bf16.msra.mxu1 %v2127_v47  ;;  %v243_v47 = vpack.c.bf16 %v227_v45, %v227_v45 }
  0x6f   :  { %1862 = vmatprep.subr.bf16.mxu1 %v2130_v49  ;;  %v1450_v49 = vld [vmem:[%s2545_s6 + $0x88] sm:$0xff] }
  0x70   :  { %1841 = vmatpush3.bf16.msra.mxu0 %v2129_v48  ;;  %v1449_v48 = vld [vmem:[%s2545_s6 + $0x80] sm:$0xff] }
  0x71   :  { %1842 = vmatprep.subr.bf16.mxu0 %v2132_v50  ;;  %v1451_v50 = vld [vmem:[%s2545_s6 + $0x90] sm:$0xff] }
  0x72   :  { %1863 = vmatpush3.bf16.msra.mxu1 %v2131_v51  ;;  %v2253_v51 = vmov 0.0|0.0  }
  0x73   :  { %1864 = vmatprep.subr.bf16.mxu1 %v2134_v53  ;;  %v1452_v53 = vld [vmem:[%s2545_s6 + $0x98] sm:$0xff] }
  0x74   :  { %1843 = vmatpush3.bf16.msra.mxu0 %v2133_v52  ;;  %v1985_v52 = vpack.c.bf16 %v1450_v49, %v1449_v48  ;;  %v1433_v48 = vld [vmem:[%s2545_s6] sm:$0xff]  ;;  %v1434_v49 = vld [vmem:[%s2545_s6 + $0x8] sm:$0xff] }
  0x75   :  { %1844 = vmatprep.subr.bf16.mxu0 %v2136_v54  ;;  %v1988_v54 = vpack.c.bf16 %v1452_v53, %v1451_v50 }
  0x76   :  { %1865 = vmatpush3.bf16.msra.mxu1 %v2135_v55  ;;  %v1453_v55 = vld [vmem:[%s2545_s6 + $0xa0] sm:$0xff] }
  0x77   :  { %1866 = vmatprep.subr.bf16.mxu1 %v2138_v57 }
  0x78   :  { %1845 = vmatpush3.bf16.msra.mxu0 %v2137_v56  ;;  %v1454_v56 = vld [vmem:[%s2545_s6 + $0xa8] sm:$0xff] }
  0x79   :  { %1846 = vmatprep.subr.bf16.mxu0 %v2140_v58  ;;  %v1991_v57 = vpack.c.bf16 %v1454_v56, %v1453_v55  ;;  %v1455_v58 = vld [vmem:[%s2545_s6 + $0xb0] sm:$0xff]  ;;  %v2009_v55 = vpack.c.bf16 %v1434_v49, %v1433_v48 }
  0x7a   :  { %1867 = vmatpush3.bf16.msra.mxu1 %v2139_v59  ;;  %v1456_v59 = vld [vmem:[%s2545_s6 + $0xb8] sm:$0xff] }
  0x7b   :  { %1868 = vmatprep.subr.bf16.mxu1 %v2142_v61  ;;  %v1457_v61 = vld [vmem:[%s2545_s6 + $0xc0] sm:$0xff] }
  0x7c   :  { %1847 = vmatpush3.bf16.msra.mxu0 %v2141_v60  ;;  %v1994_v60 = vpack.c.bf16 %v1456_v59, %v1455_v58  ;;  %v1435_v58 = vld [vmem:[%s2545_s6 + $0x10] sm:$0xff]  ;;  %v1436_v59 = vld [vmem:[%s2545_s6 + $0x18] sm:$0xff] }
  0x7d   :  { %1848 = vmatprep.subr.bf16.mxu0 %v2144_v62  ;;  %v1458_v62 = vld [vmem:[%s2545_s6 + $0xc8] sm:$0xff] }
  0x7e   :  { %1869 = vmatpush3.bf16.msra.mxu1 %v2143_v63  ;;  %v1997_v63 = vpack.c.bf16 %v1458_v62, %v1457_v61  ;;  %v1437_v61 = vld [vmem:[%s2545_s6 + $0x20] sm:$0xff]  ;;  %v1438_v62 = vld [vmem:[%s2545_s6 + $0x28] sm:$0xff] }
  0x7f   :  { %1870 = vmatprep.subr.bf16.mxu1 %v2146_v1  ;;  %v1460_v1 = vld [vmem:[%s2545_s6 + $0xd8] sm:$0xff] }
  0x80   :  { %1849 = vmatpush3.bf16.msra.mxu0 %v2145_v0  ;;  %v1459_v0 = vld [vmem:[%s2545_s6 + $0xd0] sm:$0xff] }
  0x81   :  { %1850 = vmatprep.subr.bf16.mxu0 %v2148_v2  ;;  %v2000_v2 = vpack.c.bf16 %v1460_v1, %v1459_v0  ;;  %v1439_v0 = vld [vmem:[%s2545_s6 + $0x30] sm:$0xff]  ;;  %v1440_v1 = vld [vmem:[%s2545_s6 + $0x38] sm:$0xff] }
  0x82   :  { %1871 = vmatpush3.bf16.msra.mxu1 %v2147_v3  ;;  %v1461_v3 = vld [vmem:[%s2545_s6 + $0xe0] sm:$0xff] }
  0x83   :  { %1872 = vmatprep.subr.bf16.mxu1 %v2150_v7  ;;  %v1633_v7 = vld [vmem:[%s2542_s3] ss:$0 sm:$0xff] }
  0x84   :  { %1851 = vmatpush3.bf16.msra.mxu0 %v2149_v4  ;;  %v1462_v4 = vld [vmem:[%s2545_s6 + $0xe8] sm:$0xff] }
  0x85   :  { %1392 = vmatprep.subr.bf16.mxu0 %v2252_v17  ;;  %v2003_v5 = vpack.c.bf16 %v1462_v4, %v1461_v3  ;;  %v1441_v3 = vld [vmem:[%s2545_s6 + $0x40] sm:$0xff]  ;;  %v1442_v4 = vld [vmem:[%s2545_s6 + $0x48] sm:$0xff] }
  0x86   :  { %1873 = vmatpush3.bf16.msra.mxu1 %v2153_v15 }
  0x87   :  { %1345 = vmatmul.mubr.bf16.vlgmr.msra.gmra.mrb[8].mxu0 %v239_v23  ;;  %1984 = vmatprep.subr.bf16.mxu1 %v2253_v51 }
  0x88   :  { %1393 = vmatpush1.bf16.msra.mxu0 %v2160_v24  ;;  %1746 = vmatprep.mubr.msk.bf16.mxu0 %vm1264_vm0, %v244_v30 }
  0x89   :  { %1394 = vmatprep.subr.bf16.mxu0 %v2252_v17  ;;  %1385 = vmatmul.mubr.bf16.vlgmr.msra.gmra.mrb[8].mxu1 %v241_v29 }
  0x8a   :  { %1986 = vmatpush3.bf16.msra.mxu1 %v1985_v52  ;;  %1946 = vmatprep.mubr.msk.f32.mxu1 %vm2254_vm2, %v2255_v21 }
  0x8b   :  { %1987 = vmatprep.subr.bf16.mxu1 %v2253_v51 }
  0x8c   :  { %1395 = vmatpush1.bf16.msra.mxu0 %v2161_v31 }
  0x8d   :  { %1396 = vmatprep.subr.bf16.mxu0 %v2252_v17 }
  0x8e   :  { %1989 = vmatpush3.bf16.msra.mxu1 %v1988_v54 }
  0x8f   :  { %1990 = vmatprep.subr.bf16.mxu1 %v2253_v51 }
  0x90   :  { %1397 = vmatpush1.bf16.msra.mxu0 %v2162_v36 }
  0x91   :  { %1398 = vmatprep.subr.bf16.mxu0 %v2252_v17 }
  0x92   :  { %1992 = vmatpush3.bf16.msra.mxu1 %v1991_v57 }
  0x93   :  { %1993 = vmatprep.subr.bf16.mxu1 %v2253_v51 }
  0x94   :  { %1399 = vmatpush1.bf16.msra.mxu0 %v2163_v32 }
  0x95   :  { %1400 = vmatprep.subr.bf16.mxu0 %v2252_v17 }
  0x96   :  { %1995 = vmatpush3.bf16.msra.mxu1 %v1994_v60  ;;  %v2012_v60 = vpack.c.bf16 %v1436_v59, %v1435_v58 }
  0x97   :  { %1996 = vmatprep.subr.bf16.mxu1 %v2253_v51 }
  0x98   :  { %1401 = vmatpush1.bf16.msra.mxu0 %v2164_v33  ;;  %v1682_v33 = vld [vmem:[%s2544_s5] ss:$0 sm:$0xff] }
  0x99   :  { %1402 = vmatprep.subr.bf16.mxu0 %v2252_v17 }
  0x9a   :  { %1998 = vmatpush3.bf16.msra.mxu1 %v1997_v63  ;;  %v2015_v63 = vpack.c.bf16 %v1438_v62, %v1437_v61 }
  0x9b   :  { %1999 = vmatprep.subr.bf16.mxu1 %v2253_v51 }
  0x9c   :  { %1403 = vmatpush1.bf16.msra.mxu0 %v2165_v34 }
  0x9d   :  { %1404 = vmatprep.subr.bf16.mxu0 %v2252_v17 }
  0x9e   :  { %2001 = vmatpush3.bf16.msra.mxu1 %v2000_v2  ;;  %v2018_v2 = vpack.c.bf16 %v1440_v1, %v1439_v0 }
  0x9f   :  { %2002 = vmatprep.subr.bf16.mxu1 %v2253_v51 }
  0xa0   :  { %1405 = vmatpush1.bf16.msra.mxu0 %v2166_v35 }
  0xa1   :  { %1406 = vmatprep.subr.bf16.mxu0 %v2252_v17 }
  0xa2   :  { %2004 = vmatpush3.bf16.msra.mxu1 %v2003_v5  ;;  %v2021_v5 = vpack.c.bf16 %v1442_v4, %v1441_v3 }
  0xa3   :  { %2005 = vmatprep.subr.bf16.mxu1 %v2253_v51 }
  0xa4   :  { %1407 = vmatpush1.bf16.msra.mxu0 %v2167_v37 }
  0xa5   :  { %1408 = vmatprep.subr.bf16.mxu0 %v2252_v17 }
  0xa6   :  { %2007 = vmatpush3.bf16.msra.mxu1 %v2006_v13  ;;  %v1448_v13 = vld [vmem:[%s2545_s6 + $0x78] sm:$0xff] }
  0xa7   :  { %2008 = vmatprep.subr.bf16.mxu1 %v2253_v51 }
  0xa8   :  { %1409 = vmatpush1.bf16.msra.mxu0 %v2168_v38 }
  0xa9   :  { %1410 = vmatprep.subr.bf16.mxu0 %v2252_v17 }
  0xac   :  { %1411 = vmatpush1.bf16.msra.mxu0 %v2169_v39 }
  0xad   :  { %1412 = vmatprep.subr.bf16.mxu0 %v2252_v17 }
  0xb0   :  { %1413 = vmatpush1.bf16.msra.mxu0 %v2170_v40 }
  0xb1   :  { %1414 = vmatprep.subr.bf16.mxu0 %v2252_v17 }
  0xb4   :  { %1415 = vmatpush1.bf16.msra.mxu0 %v2171_v41 }
  0xb5   :  { %1416 = vmatprep.subr.bf16.mxu0 %v2252_v17 }
  0xb8   :  { %1417 = vmatpush1.bf16.msra.mxu0 %v2172_v42 }
  0xb9   :  { %1418 = vmatprep.subr.bf16.mxu0 %v2252_v17 }
  0xbc   :  { %1419 = vmatpush1.bf16.msra.mxu0 %v2173_v43 }
  0xbd   :  { %1420 = vmatprep.subr.bf16.mxu0 %v2252_v17 }
  0xc0   :  { %1421 = vmatpush1.bf16.msra.mxu0 %v1270_v46 }
  0xc3   :  { %1425 = vmatmul.mubr.bf16.vlgmr.msra.gmra.mrb[12].mxu0 %v243_v47 }
 0x11a   :  { %v1764_v6 = vpop.f32.mrb[0].mxu0 }
 0x11b   :  { %v1765_v8 = vpop.f32.mrb[1].mxu0 }
 0x11c   :  { %v1766_v11 = vadd.f32 %v1765_v8, %v1764_v6  ;;  %v1767_v12 = vpop.f32.mrb[2].mxu0  ;;  %v1786_v14 = vpop.f32.mrb[0].mxu1  ;;  %v1443_v6 = vld [vmem:[%s2545_s6 + $0x50] sm:$0xff] }
 0x11d   :  { %v1768_v15 = vpop.f32.mrb[3].mxu0  ;;  %v1787_v17 = vpop.f32.mrb[1].mxu1  ;;  %v1447_v12 = vld [vmem:[%s2545_s6 + $0x70] sm:$0xff] }
 0x11e   :  { %v671_v16 = vadd.f32 %v1766_v11, %v1633_v7  ;;  %v1788_v18 = vadd.f32 %v1787_v17, %v1786_v14  ;;  %v1789_v19 = vpop.f32.mrb[2].mxu1  ;;  %v1444_v7 = vld [vmem:[%s2545_s6 + $0x58] sm:$0xff]  ;;  %v2027_v11 = vpack.c.bf16 %v1446_v10, %v1445_v9  ;;  %v2030_v14 = vpack.c.bf16 %v1448_v13, %v1447_v12 }
 0x11f   :  { %v1790_v20 = vpop.f32.mrb[3].mxu1  ;;  %v2024_v8 = vpack.c.bf16 %v1444_v7, %v1443_v6  ;;  %v1747_v19 = vld [vmem:[%s2546_s7] ss:$0 sm:$0xff] }
 0x120   :  { %v711_v22 = vadd.f32 %v1788_v18, %v671_v16 }
 0x13a   :  { %v1808_v23 = vpop.f32.mrb[4].mxu0 }
 0x13b   :  { %v1809_v24 = vpop.f32.mrb[5].mxu0 }
 0x13c   :  { %v1810_v25 = vadd.f32 %v1809_v24, %v1808_v23  ;;  %v1811_v26 = vpop.f32.mrb[6].mxu0  ;;  %v1830_v29 = vpop.f32.mrb[4].mxu1 }
 0x13d   :  { %v1812_v27 = vpop.f32.mrb[7].mxu0  ;;  %v1831_v30 = vpop.f32.mrb[5].mxu1 }
 0x13e   :  { %v2462_v28 = vadd.f32 %v1810_v25, %v711_v22  ;;  %v1832_v31 = vadd.f32 %v1831_v30, %v1830_v29  ;;  %v1833_v36 = vpop.f32.mrb[6].mxu1 }
 0x13f   :  { %v1834_v32 = vpop.f32.mrb[7].mxu1 }
 0x140   :  { %v1307_v34 = vadd.f32 %v1832_v31, %v1682_v33  ;;  %v756_v15 = vmax.f32 %v2462_v28, 0.0 }
 0x15a   :  { %v1852_v35 = vpop.f32.mrb[8].mxu0 }
 0x15b   :  { %v1853_v37 = vpop.f32.mrb[9].mxu0 }
 0x15c   :  { %v1854_v38 = vadd.f32 %v1853_v37, %v1852_v35  ;;  %v1855_v39 = vpop.f32.mrb[10].mxu0  ;;  %v1874_v40 = vpop.f32.mrb[8].mxu1 }
 0x15d   :  { %v1856_v41 = vpop.f32.mrb[11].mxu0  ;;  %v1875_v43 = vpop.f32.mrb[9].mxu1 }
 0x15e   :  { %v1347_v42 = vadd.f32 %v1854_v38, %v1307_v34  ;;  %v1876_v44 = vadd.f32 %v1875_v43, %v1874_v40  ;;  %v1877_v45 = vpop.f32.mrb[10].mxu1 }
 0x15f   :  { %v1878_v46 = vpop.f32.mrb[11].mxu1 }
 0x160   :  { %v1387_v47 = vadd.f32 %v1876_v44, %v1347_v42 }
 0x196   :  { %v1426_v50 = vpop.f32.mrb[12].mxu0 }
 0x197   :  { %v1427_v52 = vadd.f32 %v1426_v50, %v1387_v47  ;;  %v1428_v53 = vpop.f32.mrb[13].mxu0 }
 0x198   :  { %v1429_v54 = vpop.f32.mrb[14].mxu0 }
 0x199   :  { %v1432_v56 = vmax.f32 %v1427_v52, 0.0  ;;  %v1430_v57 = vpop.f32.mrb[15].mxu0 }
 0x19b   :  { %1947 = vmatmul.mubr.f32.vlgmr.msra.gmra.mrb[12].mxu1 %v1432_v56 }
 0x19c   :  { %2010 = vmatpush3.bf16.msra.mxu1 %v2009_v55  ;;  %1981 = vmatprep.mubr.msk.f32.mxu1 %vm2254_vm2, %v2255_v21 }
 0x19d   :  { %2011 = vmatprep.subr.bf16.mxu1 %v2253_v51 }
 0x1a0   :  { %2013 = vmatpush3.bf16.msra.mxu1 %v2012_v60 }
 0x1a1   :  { %2014 = vmatprep.subr.bf16.mxu1 %v2253_v51 }
 0x1a4   :  { %2016 = vmatpush3.bf16.msra.mxu1 %v2015_v63 }
 0x1a5   :  { %2017 = vmatprep.subr.bf16.mxu1 %v2253_v51 }
 0x1a8   :  { %2019 = vmatpush3.bf16.msra.mxu1 %v2018_v2 }
 0x1a9   :  { %2020 = vmatprep.subr.bf16.mxu1 %v2253_v51 }
 0x1ac   :  { %2022 = vmatpush3.bf16.msra.mxu1 %v2021_v5 }
 0x1ad   :  { %2023 = vmatprep.subr.bf16.mxu1 %v2253_v51 }
 0x1b0   :  { %2025 = vmatpush3.bf16.msra.mxu1 %v2024_v8 }
 0x1b1   :  { %2026 = vmatprep.subr.bf16.mxu1 %v2253_v51 }
 0x1b4   :  { %2028 = vmatpush3.bf16.msra.mxu1 %v2027_v11 }
 0x1b5   :  { %2029 = vmatprep.subr.bf16.mxu1 %v2253_v51 }
 0x1b8   :  { %2031 = vmatpush3.bf16.msra.mxu1 %v2030_v14 }
 0x1bb   :  { %1982 = vmatmul.mubr.f32.vlgmr.msra.gmra.mrb[14].mxu1 %v756_v15 }
 0x26e   :  { %v1531_v16 = vpop.f32.mrb[12].mxu1 }
 0x26f   :  { %v1948_v17 = vpop.f32.mrb[13].mxu1 }
 0x28e   :  { %v1601_v18 = vpop.f32.mrb[14].mxu1 }
 0x28f   :  { %v1602_v20 = vadd.f32 %v1601_v18, %v1531_v16  ;;  %v1983_v21 = vpop.f32.mrb[15].mxu1 }
 0x291   :  { %v1612_v22 = vadd.f32 %v1747_v19, %v1602_v20 }
 0x293   :  { %1614 = vst.msk [vmem:[#allocation7] sm:$0xff] %vm1613_vm3, %v1612_v22 }
 0x294   :  { %1619 = vsyncadd [#allocation4], 96  ;;  %s2256_s6 = smov [#allocation7]  }
 0x295   :  { %s1620_s0 = sshll.u32 %s2256_s6, 4  ;;  %s1621_s0 = int_to_ptr.vmem [resolvable:$true] %s1620_s0 }
 0x296   :  { %s2219_s23 = scalar_lea.vmem %s1621_s0, 32  ;;  %s2223_s24 = scalar_lea.vmem %s1621_s0, 128 }
 0x297   :  { %p2220_p2 = scmp.ne.s32.totalorder %s1621_s0, %s2219_s23  ;;  %p2224_p3 = scmp.lt.s32.totalorder %s1621_s0, %s1621_s0 }
 0x298   :  { %p2225_p4 = scmp.lt.s32.totalorder %s2223_s24, %s2219_s23 }
 0x29a   :  { %p2226_p5 = por %p2225_p4, %p2224_p3 }
 0x29c   :  { %p2227_p6 = pnand %p2226_p5, %p2220_p2 }
 0x29e   :  { %2230 = shalt.err (!%p2227_p6)
}
 0x29f   :  { %s2231_s7 = scalar_lea.hbm %s2547_s8, 32 }
 0x2a0   :  { %p2232_p7 = scmp.ne.s32.totalorder %s2547_s8, %s2231_s7  ;;  %p2235_p8 = scmp.lt.u32.totalorder %s2231_s7, %s2547_s8 }
 0x2a2   :  { %p2237_p9 = pnand %p2235_p8, %p2232_p7 }
 0x2a4   :  { %2240 = shalt.err (!%p2237_p9)
}
 0x2a5   :  { %s2257_s4 = smov 32   ;;  %s2258_s30 = smov 2  }
 0x2a6   :  { %1626 = dma.vmem_to_hbm [thread:$0]  %s1621_s0, 32, %s2547_s8, [#allocation4], %s2257_s4, %s2257_s4, %s2258_s30  }
 0x2a7   :  { %2245 = dma.done.wait [#allocation4], 128  }
 0x2a8   :  { %2246 = vsyncadd [#allocation4], 4294967168 }
 0x2a9   :  { %1630 = vsyncpa [#allocation3], 1 }
 0x2aa   :  { %1631 = vsyncpa [#allocation6], 1 }
 0x2ab   :  { %1632 = vsyncpa [#allocation4], 1 }

</bundles_post_ra>
